<compile_context>
chip_gen: v6e
topology: v6e:2x2x1
jax: 0.10.0
libtpu: 0.0.40
codegen_flags: <defaults>
</compile_context>

<pallas_src>
import functools

import jax
import jax.numpy as jnp
import numpy as np
from jax.experimental import pallas as pl
from jax.experimental.pallas import tpu as pltpu


def _round_up(x, m):
    return ((x + m - 1) // m) * m


def upn_kernel(
    # activations (blocked over batch)
    state_ref, action_ref, next_state_ref,
    # encoder (hidden padded to 128, weights bf16, biases f32)
    enc_w1_ref, enc_b1_ref, enc_w2_ref, enc_b2_ref,
    # decoder
    dec_w1_ref, dec_b1_ref, dec_w2_ref, dec_b2_ref,
    # dynamics (W1 split into z-part and action-part)
    dyn_w1z_ref, dyn_w1a_ref, dyn_b1_ref, dyn_w2_ref, dyn_b2_ref,
    # inverse dynamics (W1 split into z-part and z_next-part)
    inv_w1z_ref, inv_w1n_ref, inv_b1_ref, inv_w2_ref, inv_b2_ref,
    # packed lane-dense output: [z | z_next | z_pred | action_pred | state_recon | next_state_pred | pad]
    out_ref,
):
    f32 = jnp.float32
    bf16 = jnp.bfloat16
    tb = state_ref.shape[0]
    latent_dim = enc_w2_ref.shape[1]
    action_dim = inv_w2_ref.shape[1]
    state_dim = dec_w2_ref.shape[1]

    # Hoist all bias reads/broadcasts (each is used exactly once after fusion).
    enc_b1 = enc_b1_ref[...]
    enc_b2 = enc_b2_ref[...]
    dec_b1 = dec_b1_ref[...]
    dec_b2 = dec_b2_ref[...]
    dyn_b1 = dyn_b1_ref[...]
    dyn_b2 = dyn_b2_ref[...]
    inv_b1 = inv_b1_ref[...]
    inv_b2 = inv_b2_ref[...]

    def mlp(x_bf, w1_ref, b1, w2_ref, b2):
        # Linear -> ReLU -> Linear: bf16 MXU operands, f32 accumulation / VPU math.
        h = jnp.dot(x_bf, w1_ref[...], preferred_element_type=f32) + b1
        h = jnp.maximum(h, 0.0).astype(bf16)
        return jnp.dot(h, w2_ref[...], preferred_element_type=f32) + b2

    # --- encoder: one fused pass over [state ; next_state] stacked on the batch axis ---
    s_bf = state_ref[...].astype(bf16)
    ns_bf = next_state_ref[...].astype(bf16)
    enc_in = jnp.concatenate([s_bf, ns_bf], axis=0)               # (2*tb, state_dim)
    z_both = mlp(enc_in, enc_w1_ref, enc_b1, enc_w2_ref, enc_b2)  # (2*tb, latent) f32
    z = z_both[:tb]
    z_next = z_both[tb:]
    z_bf = z.astype(bf16)
    z_next_bf = z_next.astype(bf16)

    # --- dynamics(cat([z, action])) == z @ W1z + a @ W1a ---
    a_bf = action_ref[...].astype(bf16)
    dyn_h = (jnp.dot(z_bf, dyn_w1z_ref[...], preferred_element_type=f32)
             + jnp.dot(a_bf, dyn_w1a_ref[...], preferred_element_type=f32)
             + dyn_b1)
    dyn_h = jnp.maximum(dyn_h, 0.0).astype(bf16)
    z_pred = jnp.dot(dyn_h, dyn_w2_ref[...], preferred_element_type=f32) + dyn_b2

    # --- inverse_dynamics(cat([z, z_next])) == z @ W1z + z_next @ W1n ---
    inv_h = (jnp.dot(z_bf, inv_w1z_ref[...], preferred_element_type=f32)
             + jnp.dot(z_next_bf, inv_w1n_ref[...], preferred_element_type=f32)
             + inv_b1)
    inv_h = jnp.maximum(inv_h, 0.0).astype(bf16)
    action_pred = jnp.dot(inv_h, inv_w2_ref[...], preferred_element_type=f32) + inv_b2

    # --- decoder: one fused pass over [z ; z_pred] stacked on the batch axis ---
    dec_in = jnp.concatenate([z_bf, z_pred.astype(bf16)], axis=0)  # (2*tb, latent)
    dec_out = mlp(dec_in, dec_w1_ref, dec_b1, dec_w2_ref, dec_b2)  # (2*tb, state_dim)
    state_recon = dec_out[:tb]
    next_state_pred = dec_out[tb:]

    # --- pack the six results into one lane-dense slab, single unmasked store ---
    pieces = [z, z_next, z_pred, action_pred, state_recon, next_state_pred]
    used = 3 * latent_dim + action_dim + 2 * state_dim
    pad = out_ref.shape[1] - used
    if pad > 0:
        pieces.append(jnp.zeros((tb, pad), f32))
    out_ref[...] = jnp.concatenate(pieces, axis=-1)


# ---------------------------------------------------------------------------
# Parameters
# ---------------------------------------------------------------------------

def init_linear(key, fan_in, fan_out):
    """Deterministic init mimicking PyTorch nn.Linear's U(-1/sqrt(in), 1/sqrt(in)).
    Stored as (in, out) so y = x @ W + b (transpose of nn.Linear.weight)."""
    kw, kb = jax.random.split(key)
    bound = 1.0 / (fan_in ** 0.5)
    w = jax.random.uniform(kw, (fan_in, fan_out), jnp.float32, -bound, bound)
    b = jax.random.uniform(kb, (1, fan_out), jnp.float32, -bound, bound)
    return w, b


def make_upn_params(key, state_dim, action_dim, latent_dim, hidden=64):
    """Raw f32 parameters exactly matching the PyTorch module."""
    keys = jax.random.split(key, 8)
    enc_w1, enc_b1 = init_linear(keys[0], state_dim, hidden)
    enc_w2, enc_b2 = init_linear(keys[1], hidden, latent_dim)
    dec_w1, dec_b1 = init_linear(keys[2], latent_dim, hidden)
    dec_w2, dec_b2 = init_linear(keys[3], hidden, state_dim)
    dyn_w1, dyn_b1 = init_linear(keys[4], latent_dim + action_dim, hidden)
    dyn_w2, dyn_b2 = init_linear(keys[5], hidden, latent_dim)
    inv_w1, inv_b1 = init_linear(keys[6], latent_dim * 2, hidden)
    inv_w2, inv_b2 = init_linear(keys[7], hidden, action_dim)
    return dict(
        enc_w1=enc_w1, enc_b1=enc_b1, enc_w2=enc_w2, enc_b2=enc_b2,
        dec_w1=dec_w1, dec_b1=dec_b1, dec_w2=dec_w2, dec_b2=dec_b2,
        dyn_w1=dyn_w1, dyn_b1=dyn_b1, dyn_w2=dyn_w2, dyn_b2=dyn_b2,
        inv_w1=inv_w1, inv_b1=inv_b1, inv_w2=inv_w2, inv_b2=inv_b2,
    )


def prepare_upn_params(raw, hidden_pad_to=128):
    """Kernel-ready params (done ONCE, outside the hot path):
    - split the concatenated-input W1 matrices,
    - zero-pad the hidden dim to a multiple of 128 (numerically exact),
    - cast matmul weights to bf16; keep biases f32."""
    latent = raw["enc_w2"].shape[1]
    hidden = raw["enc_w1"].shape[1]
    hp = _round_up(hidden, hidden_pad_to)
    dh = hp - hidden

    def pad_layer(w1, b1, w2, b2):
        w1p = jnp.pad(w1, ((0, 0), (0, dh))).astype(jnp.bfloat16)   # (in, hp)
        b1p = jnp.pad(b1, ((0, 0), (0, dh)))                        # (1, hp) f32
        w2p = jnp.pad(w2, ((0, dh), (0, 0))).astype(jnp.bfloat16)   # (hp, out)
        return w1p, b1p, w2p, b2

    enc_w1, enc_b1, enc_w2, enc_b2 = pad_layer(raw["enc_w1"], raw["enc_b1"], raw["enc_w2"], raw["enc_b2"])
    dec_w1, dec_b1, dec_w2, dec_b2 = pad_layer(raw["dec_w1"], raw["dec_b1"], raw["dec_w2"], raw["dec_b2"])
    dyn_w1, dyn_b1, dyn_w2, dyn_b2 = pad_layer(raw["dyn_w1"], raw["dyn_b1"], raw["dyn_w2"], raw["dyn_b2"])
    inv_w1, inv_b1, inv_w2, inv_b2 = pad_layer(raw["inv_w1"], raw["inv_b1"], raw["inv_w2"], raw["inv_b2"])

    return dict(
        enc_w1=enc_w1, enc_b1=enc_b1, enc_w2=enc_w2, enc_b2=enc_b2,
        dec_w1=dec_w1, dec_b1=dec_b1, dec_w2=dec_w2, dec_b2=dec_b2,
        dyn_w1z=dyn_w1[:latent], dyn_w1a=dyn_w1[latent:], dyn_b1=dyn_b1,
        dyn_w2=dyn_w2, dyn_b2=dyn_b2,
        inv_w1z=inv_w1[:latent], inv_w1n=inv_w1[latent:], inv_b1=inv_b1,
        inv_w2=inv_w2, inv_b2=inv_b2,
    )


# ---------------------------------------------------------------------------
# Pallas-call wrapper
# ---------------------------------------------------------------------------

@functools.partial(jax.jit, static_argnames=("block_batch",))
def upn_forward(state, action, next_state, kparams, *, block_batch=None):
    batch, state_dim = state.shape
    action_dim = action.shape[1]
    latent_dim = kparams["enc_w2"].shape[1]

    # Batch tile: >=128 rows per matmul when the batch allows (fills the MXU on v5e),
    # capped at 512 so double-buffered tiles fit comfortably in VMEM on v7x (64 MiB).
    tb = block_batch if block_batch is not None else min(512, _round_up(batch, 8))
    tb = max(8, _round_up(tb, 8))
    padded_b = _round_up(batch, tb)
    if padded_b != batch:
        pad_rows = padded_b - batch
        state = jnp.pad(state, ((0, pad_rows), (0, 0)))
        action = jnp.pad(action, ((0, pad_rows), (0, 0)))
        next_state = jnp.pad(next_state, ((0, pad_rows), (0, 0)))

    out_cols = _round_up(3 * latent_dim + action_dim + 2 * state_dim, 128)

    ordered = [
        kparams["enc_w1"], kparams["enc_b1"], kparams["enc_w2"], kparams["enc_b2"],
        kparams["dec_w1"], kparams["dec_b1"], kparams["dec_w2"], kparams["dec_b2"],
        kparams["dyn_w1z"], kparams["dyn_w1a"], kparams["dyn_b1"], kparams["dyn_w2"], kparams["dyn_b2"],
        kparams["inv_w1z"], kparams["inv_w1n"], kparams["inv_b1"], kparams["inv_w2"], kparams["inv_b2"],
    ]

    def act_spec(d):
        return pl.BlockSpec((tb, d), lambda i: (i, 0))

    def resident_spec(arr):
        # Constant index_map -> block never changes -> weights stay resident in VMEM.
        return pl.BlockSpec(arr.shape, lambda i: (0, 0))

    in_specs = ([act_spec(state_dim), act_spec(action_dim), act_spec(state_dim)]
                + [resident_spec(a) for a in ordered])
    out_spec = pl.BlockSpec((tb, out_cols), lambda i: (i, 0))

    packed = pl.pallas_call(
        upn_kernel,
        out_shape=jax.ShapeDtypeStruct((padded_b, out_cols), jnp.float32),
        grid=(padded_b // tb,),
        in_specs=in_specs,
        out_specs=out_spec,
        compiler_params=pltpu.CompilerParams(
            dimension_semantics=("parallel",),  # megacore-shard the batch axis (v7x)
        ),
    )(state, action, next_state, *ordered)

    offs = np.cumsum([0, latent_dim, latent_dim, latent_dim, action_dim, state_dim, state_dim])
    z = packed[:batch, offs[0]:offs[1]]
    z_next = packed[:batch, offs[1]:offs[2]]
    z_pred = packed[:batch, offs[2]:offs[3]]
    action_pred = packed[:batch, offs[3]:offs[4]]
    state_recon = packed[:batch, offs[4]:offs[5]]
    next_state_pred = packed[:batch, offs[5]:offs[6]]
    return z, z_next, z_pred, action_pred, state_recon, next_state_pred


# ---------------------------------------------------------------------------
# References
# ---------------------------------------------------------------------------

def upn_forward_ref(state, action, next_state, raw):
    """Pure-f32 JAX reference matching the PyTorch forward exactly."""
    def mlp(x, w1, b1, w2, b2):
        return jnp.maximum(x @ w1 + b1, 0.0) @ w2 + b2

    z = mlp(state, raw["enc_w1"], raw["enc_b1"], raw["enc_w2"], raw["enc_b2"])
    z_next = mlp(next_state, raw["enc_w1"], raw["enc_b1"], raw["enc_w2"], raw["enc_b2"])
    z_pred = mlp(jnp.concatenate([z, action], -1),
                 raw["dyn_w1"], raw["dyn_b1"], raw["dyn_w2"], raw["dyn_b2"])
    action_pred = mlp(jnp.concatenate([z, z_next], -1),
                      raw["inv_w1"], raw["inv_b1"], raw["inv_w2"], raw["inv_b2"])
    state_recon = mlp(z, raw["dec_w1"], raw["dec_b1"], raw["dec_w2"], raw["dec_b2"])
    next_state_pred = mlp(z_pred, raw["dec_w1"], raw["dec_b1"], raw["dec_w2"], raw["dec_b2"])
    return z, z_next, z_pred, action_pred, state_recon, next_state_pred


def upn_forward_matched_ref(state, action, next_state, kp):
    """Reference using the same bf16-operand / f32-accumulate scheme as the kernel."""
    bf16, f32 = jnp.bfloat16, jnp.float32

    def mlp(x, w1, b1, w2, b2):
        h = jnp.dot(x.astype(bf16), w1, preferred_element_type=f32) + b1
        h = jnp.maximum(h, 0.0).astype(bf16)
        return jnp.dot(h, w2, preferred_element_type=f32) + b2

    z = mlp(state, kp["enc_w1"], kp["enc_b1"], kp["enc_w2"], kp["enc_b2"])
    z_next = mlp(next_state, kp["enc_w1"], kp["enc_b1"], kp["enc_w2"], kp["enc_b2"])
    dyn_h = (jnp.dot(z.astype(bf16), kp["dyn_w1z"], preferred_element_type=f32)
             + jnp.dot(action.astype(bf16), kp["dyn_w1a"], preferred_element_type=f32)
             + kp["dyn_b1"])
    z_pred = jnp.dot(jnp.maximum(dyn_h, 0.0).astype(bf16), kp["dyn_w2"],
                     preferred_element_type=f32) + kp["dyn_b2"]
    inv_h = (jnp.dot(z.astype(bf16), kp["inv_w1z"], preferred_element_type=f32)
             + jnp.dot(z_next.astype(bf16), kp["inv_w1n"], preferred_element_type=f32)
             + kp["inv_b1"])
    action_pred = jnp.dot(jnp.maximum(inv_h, 0.0).astype(bf16), kp["inv_w2"],
                          preferred_element_type=f32) + kp["inv_b2"]
    state_recon = mlp(z, kp["dec_w1"], kp["dec_b1"], kp["dec_w2"], kp["dec_b2"])
    next_state_pred = mlp(z_pred, kp["dec_w1"], kp["dec_b1"], kp["dec_w2"], kp["dec_b2"])
    return z, z_next, z_pred, action_pred, state_recon, next_state_pred


if __name__ == "__main__":
    batch = 8
    state_dim = 16
    action_dim = 8
    latent_dim = 16

    key = jax.random.PRNGKey(0)
    k_state, k_action, k_next, k_params = jax.random.split(key, 4)

    state = jax.random.normal(k_state, (batch, state_dim), jnp.float32)
    action = jax.random.normal(k_action, (batch, action_dim), jnp.float32)
    next_state = jax.random.normal(k_next, (batch, state_dim), jnp.float32)

    raw_params = make_upn_params(k_params, state_dim, action_dim, latent_dim)
    kparams = prepare_upn_params(raw_params)

    outs = jax.block_until_ready(upn_forward(state, action, next_state, kparams))

    matched = upn_forward_matched_ref(state, action, next_state, kparams)
    full_f32 = upn_forward_ref(state, action, next_state, raw_params)
    for o, m, r in zip(outs, matched, full_f32):
        assert o.shape == r.shape and o.dtype == jnp.float32
        # Tight check against the precision-matched reference (same bf16/f32 scheme).
        assert jnp.allclose(o, m, atol=1e-3, rtol=1e-3)
        # Loose sanity check against the full-f32 PyTorch-equivalent reference.
        assert jnp.allclose(o, r, atol=1e-1, rtol=1e-1)

    print("KERNEL_OK")
</pallas_src>

<mosaic_0001>
module attributes {stable_mosaic.version = 11 : i64} {
  func.func @upn_kernel(%arg0: i32, %arg1: memref<8x16xf32, #tpu.memory_space<vmem>>, %arg2: memref<8x8xf32, #tpu.memory_space<vmem>>, %arg3: memref<8x16xf32, #tpu.memory_space<vmem>>, %arg4: memref<16x128xbf16, #tpu.memory_space<vmem>>, %arg5: memref<1x128xf32, #tpu.memory_space<vmem>>, %arg6: memref<128x16xbf16, #tpu.memory_space<vmem>>, %arg7: memref<1x16xf32, #tpu.memory_space<vmem>>, %arg8: memref<16x128xbf16, #tpu.memory_space<vmem>>, %arg9: memref<1x128xf32, #tpu.memory_space<vmem>>, %arg10: memref<128x16xbf16, #tpu.memory_space<vmem>>, %arg11: memref<1x16xf32, #tpu.memory_space<vmem>>, %arg12: memref<16x128xbf16, #tpu.memory_space<vmem>>, %arg13: memref<8x128xbf16, #tpu.memory_space<vmem>>, %arg14: memref<1x128xf32, #tpu.memory_space<vmem>>, %arg15: memref<128x16xbf16, #tpu.memory_space<vmem>>, %arg16: memref<1x16xf32, #tpu.memory_space<vmem>>, %arg17: memref<16x128xbf16, #tpu.memory_space<vmem>>, %arg18: memref<16x128xbf16, #tpu.memory_space<vmem>>, %arg19: memref<1x128xf32, #tpu.memory_space<vmem>>, %arg20: memref<128x8xbf16, #tpu.memory_space<vmem>>, %arg21: memref<1x8xf32, #tpu.memory_space<vmem>>, %arg22: memref<8x128xf32, #tpu.memory_space<vmem>>) attributes {dimension_semantics = [#tpu.dimension_semantics<parallel>], iteration_bounds = array<i64: 1>, scalar_prefetch = 0 : i64, scratch_operands = 0 : i64, tpu.core_type = #tpu.core_type<tc>, window_params = [{transform_indices = @transform_0, window_bounds = array<i64: 8, 16>}, {transform_indices = @transform_1, window_bounds = array<i64: 8, 8>}, {transform_indices = @transform_2, window_bounds = array<i64: 8, 16>}, {pipeline_mode = #tpu.pipeline_mode<synchronous>, transform_indices = @transform_3, window_bounds = array<i64: 16, 128>}, {pipeline_mode = #tpu.pipeline_mode<synchronous>, transform_indices = @transform_4, window_bounds = array<i64: 1, 128>}, {pipeline_mode = #tpu.pipeline_mode<synchronous>, transform_indices = @transform_5, window_bounds = array<i64: 128, 16>}, {pipeline_mode = #tpu.pipeline_mode<synchronous>, transform_indices = @transform_6, window_bounds = array<i64: 1, 16>}, {pipeline_mode = #tpu.pipeline_mode<synchronous>, transform_indices = @transform_7, window_bounds = array<i64: 16, 128>}, {pipeline_mode = #tpu.pipeline_mode<synchronous>, transform_indices = @transform_8, window_bounds = array<i64: 1, 128>}, {pipeline_mode = #tpu.pipeline_mode<synchronous>, transform_indices = @transform_9, window_bounds = array<i64: 128, 16>}, {pipeline_mode = #tpu.pipeline_mode<synchronous>, transform_indices = @transform_10, window_bounds = array<i64: 1, 16>}, {pipeline_mode = #tpu.pipeline_mode<synchronous>, transform_indices = @transform_11, window_bounds = array<i64: 16, 128>}, {pipeline_mode = #tpu.pipeline_mode<synchronous>, transform_indices = @transform_12, window_bounds = array<i64: 8, 128>}, {pipeline_mode = #tpu.pipeline_mode<synchronous>, transform_indices = @transform_13, window_bounds = array<i64: 1, 128>}, {pipeline_mode = #tpu.pipeline_mode<synchronous>, transform_indices = @transform_14, window_bounds = array<i64: 128, 16>}, {pipeline_mode = #tpu.pipeline_mode<synchronous>, transform_indices = @transform_15, window_bounds = array<i64: 1, 16>}, {pipeline_mode = #tpu.pipeline_mode<synchronous>, transform_indices = @transform_16, window_bounds = array<i64: 16, 128>}, {pipeline_mode = #tpu.pipeline_mode<synchronous>, transform_indices = @transform_17, window_bounds = array<i64: 16, 128>}, {pipeline_mode = #tpu.pipeline_mode<synchronous>, transform_indices = @transform_18, window_bounds = array<i64: 1, 128>}, {pipeline_mode = #tpu.pipeline_mode<synchronous>, transform_indices = @transform_19, window_bounds = array<i64: 128, 8>}, {pipeline_mode = #tpu.pipeline_mode<synchronous>, transform_indices = @transform_20, window_bounds = array<i64: 1, 8>}, {transform_indices = @transform_21, window_bounds = array<i64: 8, 128>}]} {
    %c0 = arith.constant 0 : index
    %c0_0 = arith.constant 0 : index
    %0 = vector.load %arg5[%c0, %c0_0] : memref<1x128xf32, #tpu.memory_space<vmem>>, vector<1x128xf32>
    %c0_1 = arith.constant 0 : index
    %c0_2 = arith.constant 0 : index
    %1 = vector.load %arg7[%c0_1, %c0_2] : memref<1x16xf32, #tpu.memory_space<vmem>>, vector<1x16xf32>
    %c0_3 = arith.constant 0 : index
    %c0_4 = arith.constant 0 : index
    %2 = vector.load %arg9[%c0_3, %c0_4] : memref<1x128xf32, #tpu.memory_space<vmem>>, vector<1x128xf32>
    %c0_5 = arith.constant 0 : index
    %c0_6 = arith.constant 0 : index
    %3 = vector.load %arg11[%c0_5, %c0_6] : memref<1x16xf32, #tpu.memory_space<vmem>>, vector<1x16xf32>
    %c0_7 = arith.constant 0 : index
    %c0_8 = arith.constant 0 : index
    %4 = vector.load %arg14[%c0_7, %c0_8] : memref<1x128xf32, #tpu.memory_space<vmem>>, vector<1x128xf32>
    %c0_9 = arith.constant 0 : index
    %c0_10 = arith.constant 0 : index
    %5 = vector.load %arg16[%c0_9, %c0_10] : memref<1x16xf32, #tpu.memory_space<vmem>>, vector<1x16xf32>
    %c0_11 = arith.constant 0 : index
    %c0_12 = arith.constant 0 : index
    %6 = vector.load %arg19[%c0_11, %c0_12] : memref<1x128xf32, #tpu.memory_space<vmem>>, vector<1x128xf32>
    %c0_13 = arith.constant 0 : index
    %c0_14 = arith.constant 0 : index
    %7 = vector.load %arg21[%c0_13, %c0_14] : memref<1x8xf32, #tpu.memory_space<vmem>>, vector<1x8xf32>
    %c0_15 = arith.constant 0 : index
    %c0_16 = arith.constant 0 : index
    %8 = vector.load %arg1[%c0_15, %c0_16] : memref<8x16xf32, #tpu.memory_space<vmem>>, vector<8x16xf32>
    %9 = arith.truncf %8 : vector<8x16xf32> to vector<8x16xbf16>
    %c0_17 = arith.constant 0 : index
    %c0_18 = arith.constant 0 : index
    %10 = vector.load %arg3[%c0_17, %c0_18] : memref<8x16xf32, #tpu.memory_space<vmem>>, vector<8x16xf32>
    %11 = arith.truncf %10 : vector<8x16xf32> to vector<8x16xbf16>
    %12 = tpu.concatenate %9, %11 in 0 : vector<8x16xbf16>, vector<8x16xbf16> -> vector<16x16xbf16>
    %c0_19 = arith.constant 0 : index
    %c0_20 = arith.constant 0 : index
    %13 = vector.load %arg4[%c0_19, %c0_20] : memref<16x128xbf16, #tpu.memory_space<vmem>>, vector<16x128xbf16>
    %cst = arith.constant dense<0.000000e+00> : vector<16x128xf32>
    %14 = tpu.matmul %12, %13, %cst {dimension_numbers = #tpu.dot_dimension_numbers<[1], [0], [0], [1], [0, 0, 1, 1], [], []>} : vector<16x16xbf16>, vector<16x128xbf16>, vector<16x128xf32> -> vector<16x128xf32>
    %15 = vector.broadcast %0 : vector<1x128xf32> to vector<16x128xf32>
    %16 = arith.addf %14, %15 : vector<16x128xf32>
    %cst_21 = arith.constant 0.000000e+00 : f32
    %17 = vector.broadcast %cst_21 : f32 to vector<16x128xf32>
    %18 = arith.maximumf %16, %17 : vector<16x128xf32>
    %19 = arith.truncf %18 : vector<16x128xf32> to vector<16x128xbf16>
    %c0_22 = arith.constant 0 : index
    %c0_23 = arith.constant 0 : index
    %20 = vector.load %arg6[%c0_22, %c0_23] : memref<128x16xbf16, #tpu.memory_space<vmem>>, vector<128x16xbf16>
    %cst_24 = arith.constant dense<0.000000e+00> : vector<16x16xf32>
    %21 = tpu.matmul %19, %20, %cst_24 {dimension_numbers = #tpu.dot_dimension_numbers<[1], [0], [0], [1], [0, 0, 1, 1], [], []>} : vector<16x128xbf16>, vector<128x16xbf16>, vector<16x16xf32> -> vector<16x16xf32>
    %22 = vector.broadcast %1 : vector<1x16xf32> to vector<16x16xf32>
    %23 = arith.addf %21, %22 : vector<16x16xf32>
    %24 = vector.extract_strided_slice %23 {offsets = [0, 0], sizes = [8, 16], strides = [1, 1]} : vector<16x16xf32> to vector<8x16xf32>
    %25 = vector.extract_strided_slice %23 {offsets = [8, 0], sizes = [8, 16], strides = [1, 1]} : vector<16x16xf32> to vector<8x16xf32>
    %26 = arith.truncf %24 : vector<8x16xf32> to vector<8x16xbf16>
    %27 = arith.truncf %25 : vector<8x16xf32> to vector<8x16xbf16>
    %c0_25 = arith.constant 0 : index
    %c0_26 = arith.constant 0 : index
    %28 = vector.load %arg2[%c0_25, %c0_26] : memref<8x8xf32, #tpu.memory_space<vmem>>, vector<8x8xf32>
    %29 = arith.truncf %28 : vector<8x8xf32> to vector<8x8xbf16>
    %c0_27 = arith.constant 0 : index
    %c0_28 = arith.constant 0 : index
    %30 = vector.load %arg12[%c0_27, %c0_28] : memref<16x128xbf16, #tpu.memory_space<vmem>>, vector<16x128xbf16>
    %cst_29 = arith.constant dense<0.000000e+00> : vector<8x128xf32>
    %31 = tpu.matmul %26, %30, %cst_29 {dimension_numbers = #tpu.dot_dimension_numbers<[1], [0], [0], [1], [0, 0, 1, 1], [], []>} : vector<8x16xbf16>, vector<16x128xbf16>, vector<8x128xf32> -> vector<8x128xf32>
    %c0_30 = arith.constant 0 : index
    %c0_31 = arith.constant 0 : index
    %32 = vector.load %arg13[%c0_30, %c0_31] : memref<8x128xbf16, #tpu.memory_space<vmem>>, vector<8x128xbf16>
    %cst_32 = arith.constant dense<0.000000e+00> : vector<8x128xf32>
    %33 = tpu.matmul %29, %32, %cst_32 {dimension_numbers = #tpu.dot_dimension_numbers<[1], [0], [0], [1], [0, 0, 1, 1], [], []>} : vector<8x8xbf16>, vector<8x128xbf16>, vector<8x128xf32> -> vector<8x128xf32>
    %34 = arith.addf %31, %33 : vector<8x128xf32>
    %35 = vector.broadcast %4 : vector<1x128xf32> to vector<8x128xf32>
    %36 = arith.addf %34, %35 : vector<8x128xf32>
    %cst_33 = arith.constant 0.000000e+00 : f32
    %37 = vector.broadcast %cst_33 : f32 to vector<8x128xf32>
    %38 = arith.maximumf %36, %37 : vector<8x128xf32>
    %39 = arith.truncf %38 : vector<8x128xf32> to vector<8x128xbf16>
    %c0_34 = arith.constant 0 : index
    %c0_35 = arith.constant 0 : index
    %40 = vector.load %arg15[%c0_34, %c0_35] : memref<128x16xbf16, #tpu.memory_space<vmem>>, vector<128x16xbf16>
    %cst_36 = arith.constant dense<0.000000e+00> : vector<8x16xf32>
    %41 = tpu.matmul %39, %40, %cst_36 {dimension_numbers = #tpu.dot_dimension_numbers<[1], [0], [0], [1], [0, 0, 1, 1], [], []>} : vector<8x128xbf16>, vector<128x16xbf16>, vector<8x16xf32> -> vector<8x16xf32>
    %42 = vector.broadcast %5 : vector<1x16xf32> to vector<8x16xf32>
    %43 = arith.addf %41, %42 : vector<8x16xf32>
    %c0_37 = arith.constant 0 : index
    %c0_38 = arith.constant 0 : index
    %44 = vector.load %arg17[%c0_37, %c0_38] : memref<16x128xbf16, #tpu.memory_space<vmem>>, vector<16x128xbf16>
    %cst_39 = arith.constant dense<0.000000e+00> : vector<8x128xf32>
    %45 = tpu.matmul %26, %44, %cst_39 {dimension_numbers = #tpu.dot_dimension_numbers<[1], [0], [0], [1], [0, 0, 1, 1], [], []>} : vector<8x16xbf16>, vector<16x128xbf16>, vector<8x128xf32> -> vector<8x128xf32>
    %c0_40 = arith.constant 0 : index
    %c0_41 = arith.constant 0 : index
    %46 = vector.load %arg18[%c0_40, %c0_41] : memref<16x128xbf16, #tpu.memory_space<vmem>>, vector<16x128xbf16>
    %cst_42 = arith.constant dense<0.000000e+00> : vector<8x128xf32>
    %47 = tpu.matmul %27, %46, %cst_42 {dimension_numbers = #tpu.dot_dimension_numbers<[1], [0], [0], [1], [0, 0, 1, 1], [], []>} : vector<8x16xbf16>, vector<16x128xbf16>, vector<8x128xf32> -> vector<8x128xf32>
    %48 = arith.addf %45, %47 : vector<8x128xf32>
    %49 = vector.broadcast %6 : vector<1x128xf32> to vector<8x128xf32>
    %50 = arith.addf %48, %49 : vector<8x128xf32>
    %cst_43 = arith.constant 0.000000e+00 : f32
    %51 = vector.broadcast %cst_43 : f32 to vector<8x128xf32>
    %52 = arith.maximumf %50, %51 : vector<8x128xf32>
    %53 = arith.truncf %52 : vector<8x128xf32> to vector<8x128xbf16>
    %c0_44 = arith.constant 0 : index
    %c0_45 = arith.constant 0 : index
    %54 = vector.load %arg20[%c0_44, %c0_45] : memref<128x8xbf16, #tpu.memory_space<vmem>>, vector<128x8xbf16>
    %cst_46 = arith.constant dense<0.000000e+00> : vector<8x8xf32>
    %55 = tpu.matmul %53, %54, %cst_46 {dimension_numbers = #tpu.dot_dimension_numbers<[1], [0], [0], [1], [0, 0, 1, 1], [], []>} : vector<8x128xbf16>, vector<128x8xbf16>, vector<8x8xf32> -> vector<8x8xf32>
    %56 = vector.broadcast %7 : vector<1x8xf32> to vector<8x8xf32>
    %57 = arith.addf %55, %56 : vector<8x8xf32>
    %58 = arith.truncf %43 : vector<8x16xf32> to vector<8x16xbf16>
    %59 = tpu.concatenate %26, %58 in 0 : vector<8x16xbf16>, vector<8x16xbf16> -> vector<16x16xbf16>
    %c0_47 = arith.constant 0 : index
    %c0_48 = arith.constant 0 : index
    %60 = vector.load %arg8[%c0_47, %c0_48] : memref<16x128xbf16, #tpu.memory_space<vmem>>, vector<16x128xbf16>
    %cst_49 = arith.constant dense<0.000000e+00> : vector<16x128xf32>
    %61 = tpu.matmul %59, %60, %cst_49 {dimension_numbers = #tpu.dot_dimension_numbers<[1], [0], [0], [1], [0, 0, 1, 1], [], []>} : vector<16x16xbf16>, vector<16x128xbf16>, vector<16x128xf32> -> vector<16x128xf32>
    %62 = vector.broadcast %2 : vector<1x128xf32> to vector<16x128xf32>
    %63 = arith.addf %61, %62 : vector<16x128xf32>
    %cst_50 = arith.constant 0.000000e+00 : f32
    %64 = vector.broadcast %cst_50 : f32 to vector<16x128xf32>
    %65 = arith.maximumf %63, %64 : vector<16x128xf32>
    %66 = arith.truncf %65 : vector<16x128xf32> to vector<16x128xbf16>
    %c0_51 = arith.constant 0 : index
    %c0_52 = arith.constant 0 : index
    %67 = vector.load %arg10[%c0_51, %c0_52] : memref<128x16xbf16, #tpu.memory_space<vmem>>, vector<128x16xbf16>
    %cst_53 = arith.constant dense<0.000000e+00> : vector<16x16xf32>
    %68 = tpu.matmul %66, %67, %cst_53 {dimension_numbers = #tpu.dot_dimension_numbers<[1], [0], [0], [1], [0, 0, 1, 1], [], []>} : vector<16x128xbf16>, vector<128x16xbf16>, vector<16x16xf32> -> vector<16x16xf32>
    %69 = vector.broadcast %3 : vector<1x16xf32> to vector<16x16xf32>
    %70 = arith.addf %68, %69 : vector<16x16xf32>
    %71 = vector.extract_strided_slice %70 {offsets = [0, 0], sizes = [8, 16], strides = [1, 1]} : vector<16x16xf32> to vector<8x16xf32>
    %72 = vector.extract_strided_slice %70 {offsets = [8, 0], sizes = [8, 16], strides = [1, 1]} : vector<16x16xf32> to vector<8x16xf32>
    %cst_54 = arith.constant 0.000000e+00 : f32
    %73 = vector.broadcast %cst_54 : f32 to vector<8x40xf32>
    %74 = tpu.concatenate %24, %25, %43, %57, %71, %72, %73 in 1 : vector<8x16xf32>, vector<8x16xf32>, vector<8x16xf32>, vector<8x8xf32>, vector<8x16xf32>, vector<8x16xf32>, vector<8x40xf32> -> vector<8x128xf32>
    %c0_55 = arith.constant 0 : index
    %c0_56 = arith.constant 0 : index
    %75 = vector.load %arg22[%c0_55, %c0_56] : memref<8x128xf32, #tpu.memory_space<vmem>>, vector<8x128xf32>
    tpu.vector_store %arg22[%c0_55, %c0_56], %74 {strides = array<i32>} : memref<8x128xf32, #tpu.memory_space<vmem>>, vector<8x128xf32>,
    return
  }
  func.func @transform_0(%arg0: i32) -> (i32, i32) {
    %c0_i32 = arith.constant 0 : i32
    %c0_i32_0 = arith.constant 0 : i32
    return %arg0, %c0_i32 : i32, i32
  }
  func.func @transform_1(%arg0: i32) -> (i32, i32) {
    %c0_i32 = arith.constant 0 : i32
    %c0_i32_0 = arith.constant 0 : i32
    return %arg0, %c0_i32 : i32, i32
  }
  func.func @transform_2(%arg0: i32) -> (i32, i32) {
    %c0_i32 = arith.constant 0 : i32
    %c0_i32_0 = arith.constant 0 : i32
    return %arg0, %c0_i32 : i32, i32
  }
  func.func @transform_3(%arg0: i32) -> (i32, i32) {
    %c0_i32 = arith.constant 0 : i32
    %c0_i32_0 = arith.constant 0 : i32
    %c0_i32_1 = arith.constant 0 : i32
    return %c0_i32, %c0_i32_0 : i32, i32
  }
  func.func @transform_4(%arg0: i32) -> (i32, i32) {
    %c0_i32 = arith.constant 0 : i32
    %c0_i32_0 = arith.constant 0 : i32
    %c0_i32_1 = arith.constant 0 : i32
    return %c0_i32, %c0_i32_0 : i32, i32
  }
  func.func @transform_5(%arg0: i32) -> (i32, i32) {
    %c0_i32 = arith.constant 0 : i32
    %c0_i32_0 = arith.constant 0 : i32
    %c0_i32_1 = arith.constant 0 : i32
    return %c0_i32, %c0_i32_0 : i32, i32
  }
  func.func @transform_6(%arg0: i32) -> (i32, i32) {
    %c0_i32 = arith.constant 0 : i32
    %c0_i32_0 = arith.constant 0 : i32
    %c0_i32_1 = arith.constant 0 : i32
    return %c0_i32, %c0_i32_0 : i32, i32
  }
  func.func @transform_7(%arg0: i32) -> (i32, i32) {
    %c0_i32 = arith.constant 0 : i32
    %c0_i32_0 = arith.constant 0 : i32
    %c0_i32_1 = arith.constant 0 : i32
    return %c0_i32, %c0_i32_0 : i32, i32
  }
  func.func @transform_8(%arg0: i32) -> (i32, i32) {
    %c0_i32 = arith.constant 0 : i32
    %c0_i32_0 = arith.constant 0 : i32
    %c0_i32_1 = arith.constant 0 : i32
    return %c0_i32, %c0_i32_0 : i32, i32
  }
  func.func @transform_9(%arg0: i32) -> (i32, i32) {
    %c0_i32 = arith.constant 0 : i32
    %c0_i32_0 = arith.constant 0 : i32
    %c0_i32_1 = arith.constant 0 : i32
    return %c0_i32, %c0_i32_0 : i32, i32
  }
  func.func @transform_10(%arg0: i32) -> (i32, i32) {
    %c0_i32 = arith.constant 0 : i32
    %c0_i32_0 = arith.constant 0 : i32
    %c0_i32_1 = arith.constant 0 : i32
    return %c0_i32, %c0_i32_0 : i32, i32
  }
  func.func @transform_11(%arg0: i32) -> (i32, i32) {
    %c0_i32 = arith.constant 0 : i32
    %c0_i32_0 = arith.constant 0 : i32
    %c0_i32_1 = arith.constant 0 : i32
    return %c0_i32, %c0_i32_0 : i32, i32
  }
  func.func @transform_12(%arg0: i32) -> (i32, i32) {
    %c0_i32 = arith.constant 0 : i32
    %c0_i32_0 = arith.constant 0 : i32
    %c0_i32_1 = arith.constant 0 : i32
    return %c0_i32, %c0_i32_0 : i32, i32
  }
  func.func @transform_13(%arg0: i32) -> (i32, i32) {
    %c0_i32 = arith.constant 0 : i32
    %c0_i32_0 = arith.constant 0 : i32
    %c0_i32_1 = arith.constant 0 : i32
    return %c0_i32, %c0_i32_0 : i32, i32
  }
  func.func @transform_14(%arg0: i32) -> (i32, i32) {
    %c0_i32 = arith.constant 0 : i32
    %c0_i32_0 = arith.constant 0 : i32
    %c0_i32_1 = arith.constant 0 : i32
    return %c0_i32, %c0_i32_0 : i32, i32
  }
  func.func @transform_15(%arg0: i32) -> (i32, i32) {
    %c0_i32 = arith.constant 0 : i32
    %c0_i32_0 = arith.constant 0 : i32
    %c0_i32_1 = arith.constant 0 : i32
    return %c0_i32, %c0_i32_0 : i32, i32
  }
  func.func @transform_16(%arg0: i32) -> (i32, i32) {
    %c0_i32 = arith.constant 0 : i32
    %c0_i32_0 = arith.constant 0 : i32
    %c0_i32_1 = arith.constant 0 : i32
    return %c0_i32, %c0_i32_0 : i32, i32
  }
  func.func @transform_17(%arg0: i32) -> (i32, i32) {
    %c0_i32 = arith.constant 0 : i32
    %c0_i32_0 = arith.constant 0 : i32
    %c0_i32_1 = arith.constant 0 : i32
    return %c0_i32, %c0_i32_0 : i32, i32
  }
  func.func @transform_18(%arg0: i32) -> (i32, i32) {
    %c0_i32 = arith.constant 0 : i32
    %c0_i32_0 = arith.constant 0 : i32
    %c0_i32_1 = arith.constant 0 : i32
    return %c0_i32, %c0_i32_0 : i32, i32
  }
  func.func @transform_19(%arg0: i32) -> (i32, i32) {
    %c0_i32 = arith.constant 0 : i32
    %c0_i32_0 = arith.constant 0 : i32
    %c0_i32_1 = arith.constant 0 : i32
    return %c0_i32, %c0_i32_0 : i32, i32
  }
  func.func @transform_20(%arg0: i32) -> (i32, i32) {
    %c0_i32 = arith.constant 0 : i32
    %c0_i32_0 = arith.constant 0 : i32
    %c0_i32_1 = arith.constant 0 : i32
    return %c0_i32, %c0_i32_0 : i32, i32
  }
  func.func @transform_21(%arg0: i32) -> (i32, i32) {
    %c0_i32 = arith.constant 0 : i32
    %c0_i32_0 = arith.constant 0 : i32
    return %arg0, %c0_i32 : i32, i32
  }
}

</mosaic_0001>

<bundles_post_ra>
// kernel: upn_forward.1
= control target key start
LH: loop header
LB: loop body
LE: loop exit
PB: predicated region body
PF: predicated region fallthrough
CT: control target
= control target key end

     0   :  { %v1170_v0 = vmov 0.0   ;;  %vm1171_vm0 = vmmov 0   ;;  %vm83_vm1 = vcmask 1043456   ;;  %vm101_vm2 = vcmask 130048   ;;  %s1517_s3 = inlined_call_operand.vmem [shape: bf16[16,128], index: 3, kind: input, shape index: {}]   ;;  %s1518_s0 = inlined_call_operand.vmem [shape: f32[8,16], index: 0, kind: input, shape index: {}]   ;;  %s1519_s2 = inlined_call_operand.vmem [shape: f32[8,16], index: 2, kind: input, shape index: {}]   ;;  %s1520_s5 = inlined_call_operand.vmem [shape: bf16[128,16], index: 5, kind: input, shape index: {}]   ;;  %s1521_s12 = inlined_call_operand.vmem [shape: bf16[8,128], index: 12, kind: input, shape index: {}]   ;;  %s1522_s1 = inlined_call_operand.vmem [shape: f32[8,8], index: 1, kind: input, shape index: {}]   ;;  %s1523_s11 = inlined_call_operand.vmem [shape: bf16[16,128], index: 11, kind: input, shape index: {}]   ;;  %s1524_s4 = inlined_call_operand.vmem [shape: f32[1,128], index: 4, kind: input, shape index: {}]   ;;  %s1525_s17 = inlined_call_operand.vmem [shape: bf16[16,128], index: 17, kind: input, shape index: {}]   ;;  %s1526_s16 = inlined_call_operand.vmem [shape: bf16[16,128], index: 16, kind: input, shape index: {}]   ;;  %s1527_s14 = inlined_call_operand.vmem [shape: bf16[128,16], index: 14, kind: input, shape index: {}]   ;;  %s1528_s6 = inlined_call_operand.vmem [shape: f32[1,16], index: 6, kind: input, shape index: {}]   ;;  %s1529_s19 = inlined_call_operand.vmem [shape: bf16[128,8], index: 19, kind: input, shape index: {}]   ;;  %s1530_s13 = inlined_call_operand.vmem [shape: f32[1,128], index: 13, kind: input, shape index: {}]   ;;  %s1531_s18 = inlined_call_operand.vmem [shape: f32[1,128], index: 18, kind: input, shape index: {}]   ;;  %s1532_s7 = inlined_call_operand.vmem [shape: bf16[16,128], index: 7, kind: input, shape index: {}]   ;;  %s1533_s15 = inlined_call_operand.vmem [shape: f32[1,16], index: 15, kind: input, shape index: {}]   ;;  %s1534_s9 = inlined_call_operand.vmem [shape: bf16[128,16], index: 9, kind: input, shape index: {}]   ;;  %s1535_s20 = inlined_call_operand.vmem [shape: f32[1,8], index: 20, kind: input, shape index: {}]   ;;  %s1536_s8 = inlined_call_operand.vmem [shape: f32[1,128], index: 8, kind: input, shape index: {}]   ;;  %s1537_s10 = inlined_call_operand.vmem [shape: f32[1,16], index: 10, kind: input, shape index: {}]   ;;  %s1538_s21 = inlined_call_operand.vmem [shape: f32[8,128], index: 21, kind: output, shape index: {}]  }
   0x1   :  { %1540 = sst [smem:[#allocation2_spill]] %s1517_s3  ;;  %1010 = vmatprep.subr.bf16.mxu1 %v1170_v0  ;;  %1012 = vmatprep.mubr.msk.bf16.mxu1 %vm1171_vm0, %v1170_v0  ;;  %vm266_vm3 = vcmask 64512   ;;  %v1142_v20 = vld [vmem:[%s1523_s11] sm:$0xff]   ;;  %v1145_v40 = vld [vmem:[%s1527_s14 + $0x38] sm:$0xff]   ;;  %v1146_v45 = vld [vmem:[%s1527_s14 + $0x30] sm:$0xff]   ;;  %vm896_vm4 = vcmask 261120  }
   0x2   :  { %1541 = sst [smem:[#allocation3_spill]] %s1518_s0  ;;  %1036 = vmatprep.subr.bf16.mxu0 %v1170_v0  ;;  %1038 = vmatprep.mubr.msk.bf16.mxu0 %vm1171_vm0, %v1170_v0  ;;  %v911_v21 = vld [vmem:[%s1524_s4] ss:$0 sm:$0xff]  ;;  %s1172_s0 = smov 16   ;;  %v1147_v48 = vld [vmem:[%s1527_s14 + $0x28] sm:$0xff]   ;;  %v1149_v49 = vld [vmem:[%s1529_s19 + $0x38] sm:$0xff]  }
   0x3   :  { %1542 = sst [smem:[#allocation4_spill]] %s1519_s2  ;;  %v1143_v31 = vld [vmem:[%s1525_s17] sm:$0xff]   ;;  %v1151_v51 = vld [vmem:[%s1529_s19 + $0x30] sm:$0xff]   ;;  %v1150_v52 = vld [vmem:[%s1527_s14 + $0x18] sm:$0xff]   ;;  %vm898_vm5 = vcmask 392192   ;;  %vm900_vm6 = vcmask 457728  }
   0x4   :  { %1543 = sst [smem:[#allocation5_spill]] %s1520_s5  ;;  %v914_v34 = vld [vmem:[%s1528_s6] ss:$0 sm:$0xff]  ;;  %v1153_v53 = vld [vmem:[%s1529_s19 + $0x28] sm:$0xff]   ;;  %v1152_v54 = vld [vmem:[%s1527_s14 + $0x10] sm:$0xff]   ;;  %vm902_vm7 = vcmask 588800  }
   0x5   :  { %1544 = sst [smem:[#allocation6_spill]] %s1521_s12  ;;  %v1144_v43 = vld [vmem:[%s1526_s16] sm:$0xff]   ;;  %v1154_v55 = vld [vmem:[%s1527_s14 + $0x8] sm:$0xff]   ;;  %v1157_v58 = vld [vmem:[%s1529_s19 + $0x18] sm:$0xff]   ;;  %vm904_vm8 = vcmask 719872  }
   0x6   :  { %1545 = sst [smem:[#allocation7_spill]] %s1522_s1  ;;  %v1148_v50 = vld [vmem:[%s1527_s14 + $0x20] sm:$0xff]   ;;  %v1158_v59 = vld [vmem:[%s1529_s19 + $0x10] sm:$0xff]   ;;  %v1159_v60 = vld [vmem:[%s1529_s19 + $0x8] sm:$0xff]  }
   0x7   :  { %s1546_s26 = sld [smem:[#allocation2_spill]]  ;;  %v1155_v56 = vld [vmem:[%s1529_s19 + $0x20] sm:$0xff]  }
   0x8   :  { %s1547_s28 = sld [smem:[#allocation3_spill]]  ;;  %v1156_v57 = vld [vmem:[%s1527_s14] sm:$0xff]  }
   0x9   :  { %s1548_s12 = sld [smem:[#allocation4_spill]]  ;;  %v1160_v61 = vld [vmem:[%s1529_s19] sm:$0xff]  }
   0xa   :  { %s1549_s22 = sld [smem:[#allocation5_spill]]  ;;  %v926_v62 = vld [vmem:[%s1530_s13] ss:$0 sm:$0xff] }
   0xb   :  { %s1550_s24 = sld [smem:[#allocation6_spill]] }
   0xd   :  { %v1133_v1 = vld [vmem:[%s1546_s26] sm:$0xff]   ;;  %s1551_s26 = sld [smem:[#allocation7_spill]] }
   0xe   :  { %v77_v2 = vld [vmem:[%s1547_s28] sm:$0xff]  ;;  %1011 = vmatpush3.bf16.msra.mxu1 %v1133_v1 }
   0xf   :  { %v79_v3 = vld [vmem:[%s1548_s12] sm:$0xff]  ;;  %v78_v4 = vpack.c.bf16 %v77_v2, %v77_v2  ;;  %1016 = vmatprep.subr.bf16.mxu1 %v1170_v0 }
  0x10   :  { %v80_v5 = vpack.c.bf16 %v79_v3, %v79_v3  ;;  %v1134_v7 = vld [vmem:[%s1549_s22 + $0x38] sm:$0xff]   ;;  %v1135_v9 = vld [vmem:[%s1549_s22 + $0x30] sm:$0xff]   ;;  %v1136_v10 = vld [vmem:[%s1549_s22 + $0x28] sm:$0xff]  }
  0x11   :  { %v1137_v11 = vld [vmem:[%s1549_s22 + $0x20] sm:$0xff]   ;;  %v1138_v12 = vld [vmem:[%s1549_s22 + $0x18] sm:$0xff]   ;;  %v1139_v13 = vld [vmem:[%s1549_s22 + $0x10] sm:$0xff]  }
  0x12   :  { %v82_v6 = vrot.slane %v80_v5, 4  ;;  %v1140_v14 = vld [vmem:[%s1549_s22 + $0x8] sm:$0xff]   ;;  %v1141_v15 = vld [vmem:[%s1549_s22] sm:$0xff]  }
  0x13   :  { %v265_v16 = vld [vmem:[%s1550_s24] sm:$0xf] }
  0x14   :  { %v86_v8 = vsel %vm83_vm1, %v78_v4, %v82_v6  ;;  %v261_v17 = vld [vmem:[%s1551_s26] sm:$0xff]  ;;  %v271_v18 = vsel %vm83_vm1, %v265_v16, 0 }
  0x15   :  { %1013 = vmatmul.mubr.msk.bf16.vlgmr.msra.gmra.mxu1 %vm101_vm2, %v86_v8  ;;  %v262_v19 = vpack.c.bf16 %v261_v17, %v261_v17  ;;  %1037 = vmatpush3.bf16.msra.mxu0 %v271_v18 }
  0x16   :  { %1017 = vmatpush3.bf16.msra.mxu1 %v1134_v7  ;;  %1032 = vmatprep.mubr.msk.bf16.mxu1 %vm1171_vm0, %v1170_v0 }
  0x17   :  { %1018 = vmatprep.subr.bf16.mxu1 %v1170_v0  ;;  %1042 = vmatprep.subr.bf16.mxu0 %v1170_v0 }
  0x18   :  { %1039 = vmatmul.mubr.msk.bf16.vlgmr.msra.gmra.mxu0 %vm266_vm3, %v262_v19 }
  0x19   :  { %1043 = vmatpush3.bf16.msra.mxu0 %v1142_v20  ;;  %1044 = vmatprep.mubr.msk.bf16.mxu0 %vm1171_vm0, %v1170_v0 }
  0x1a   :  { %1019 = vmatpush3.bf16.msra.mxu1 %v1135_v9  ;;  %1048 = vmatprep.subr.bf16.mxu0 %v1170_v0 }
  0x1b   :  { %1020 = vmatprep.subr.bf16.mxu1 %v1170_v0 }
  0x1e   :  { %1021 = vmatpush3.bf16.msra.mxu1 %v1136_v10 }
  0x1f   :  { %1022 = vmatprep.subr.bf16.mxu1 %v1170_v0 }
  0x22   :  { %1023 = vmatpush3.bf16.msra.mxu1 %v1137_v11 }
  0x23   :  { %1024 = vmatprep.subr.bf16.mxu1 %v1170_v0 }
  0x26   :  { %1025 = vmatpush3.bf16.msra.mxu1 %v1138_v12  ;;  %v940_v12 = vld [vmem:[%s1531_s18] ss:$0 sm:$0xff]  ;;  %s1173_s18 = smov 32  }
  0x27   :  { %1026 = vmatprep.subr.bf16.mxu1 %v1170_v0 }
  0x2a   :  { %1027 = vmatpush3.bf16.msra.mxu1 %v1139_v13 }
  0x2b   :  { %1028 = vmatprep.subr.bf16.mxu1 %v1170_v0 }
  0x2e   :  { %1029 = vmatpush3.bf16.msra.mxu1 %v1140_v14 }
  0x2f   :  { %1030 = vmatprep.subr.bf16.mxu1 %v1170_v0 }
  0x32   :  { %1031 = vmatpush3.bf16.msra.mxu1 %v1141_v15 }
  0x33   :  { %1068 = vmatprep.subr.bf16.mxu1 %v1170_v0 }
  0xd5   :  { %v138_v22 = vpop.f32.mrf.mxu1 }
  0xd6   :  { %v139_v24 = vadd.f32 %v911_v21, %v138_v22  ;;  %v927_v22 = vld [vmem:[%s1533_s15] ss:$0 sm:$0xff] }
  0xd7   :  { %v1014_v23 = vpop.f32.mrf.mxu1 }
  0xd8   :  { %v145_v28 = vmax.f32 %v139_v24, 0.0  ;;  %v1362_v32 = vpop.f32.mrf.mxu0 }
  0xd9   :  { %v141_v25 = vpop.f32.mrf.mxu1 }
  0xda   :  { %v142_v26 = vadd.f32 %v911_v21, %v141_v25  ;;  %v1040_v33 = vpop.f32.mrf.mxu0  ;;  %v1161_v21 = vld [vmem:[%s1532_s7] sm:$0xff]  }
  0xdb   :  { %v1015_v27 = vpop.f32.mrf.mxu1  ;;  %v941_v33 = vld [vmem:[%s1535_s20] ss:$0 sm:$0xff] }
  0xdc   :  { %v146_v29 = vmax.f32 %v142_v26, 0.0  ;;  %v310_v35 = vpop.f32.mrf.mxu0 }
  0xde   :  { %v147_v30 = vpack.c.bf16 %v146_v29, %v145_v28  ;;  %v1041_v37 = vpop.f32.mrf.mxu0  ;;  %v1162_v29 = vld [vmem:[%s1534_s9 + $0x38] sm:$0xff]  }
  0xe0   :  { %1033 = vmatmul.mubr.bf16.vlgmr.msra.gmra.mxu1 %v147_v30 }
  0xe1   :  { %1070 = vmatprep.mubr.msk.bf16.mxu1 %vm1171_vm0, %v1170_v0  ;;  %1069 = vmatpush3.bf16.msra.mxu1 %v1143_v31 }
  0xe2   :  { %1074 = vmatprep.subr.bf16.mxu1 %v1170_v0 }
 0x1a0   :  { %v252_v36 = vpop.f32.mrf.mxu1 }
 0x1a1   :  { %v1367_v38 = vadd.f32 %v914_v34, %v252_v36  ;;  %v1164_v36 = vld [vmem:[%s1534_s9 + $0x28] sm:$0xff]  }
 0x1a2   :  { %v1034_v39 = vpop.f32.mrf.mxu1 }
 0x1a3   :  { %v1374_v41 = vpack.c.bf16 %v1367_v38, %v1367_v38 }
 0x1a4   :  { %v255_v42 = vpop.f32.mrf.mxu1 }
 0x1a5   :  { %v256_v44 = vadd.f32 %v914_v34, %v255_v42  ;;  %1045 = vmatmul.mubr.msk.bf16.vlgmr.msra.gmra.mxu0 %vm101_vm2, %v1374_v41  ;;  %v1166_v42 = vld [vmem:[%s1534_s9 + $0x18] sm:$0xff]  }
 0x1a6   :  { %v1035_v46 = vpop.f32.mrf.mxu1  ;;  %1049 = vmatpush3.bf16.msra.mxu0 %v1145_v40  ;;  %1064 = vmatprep.mubr.msk.bf16.mxu0 %vm1171_vm0, %v1170_v0  ;;  %v1165_v40 = vld [vmem:[%s1534_s9 + $0x20] sm:$0xff]  }
 0x1a7   :  { %v260_v47 = vpack.c.bf16 %v256_v44, %v256_v44  ;;  %876 = vrot.lane.b32.xlu0 %v256_v44, %s1172_s0  ;;  %1050 = vmatprep.subr.bf16.mxu0 %v1170_v0  ;;  %s1174_s0 = smov 48   ;;  %v1168_v44 = vld [vmem:[%s1534_s9 + $0x8] sm:$0xff]   ;;  %v950_v46 = vld [vmem:[%s1536_s8] ss:$0 sm:$0xff]  ;;  %s1176_s8 = smov 72  }
 0x1a9   :  { %1071 = vmatmul.mubr.msk.bf16.vlgmr.msra.gmra.mxu1 %vm101_vm2, %v260_v47 }
 0x1aa   :  { %1075 = vmatpush3.bf16.msra.mxu1 %v1144_v43  ;;  %1076 = vmatprep.mubr.msk.bf16.mxu1 %vm1171_vm0, %v1170_v0  ;;  %v1167_v43 = vld [vmem:[%s1534_s9 + $0x10] sm:$0xff]  }
 0x1ab   :  { %1051 = vmatpush3.bf16.msra.mxu0 %v1146_v45  ;;  %1080 = vmatprep.subr.bf16.mxu1 %v1170_v0  ;;  %v1169_v45 = vld [vmem:[%s1534_s9] sm:$0xff]  }
 0x1ac   :  { %1052 = vmatprep.subr.bf16.mxu0 %v1170_v0 }
 0x1af   :  { %1053 = vmatpush3.bf16.msra.mxu0 %v1147_v48 }
 0x1b0   :  { %1054 = vmatprep.subr.bf16.mxu0 %v1170_v0 }
 0x1b1   :  { %1077 = vmatmul.mubr.msk.bf16.vlgmr.msra.gmra.mxu1 %vm101_vm2, %v1374_v41 }
 0x1b2   :  { %1081 = vmatpush3.bf16.msra.mxu1 %v1149_v49  ;;  %1096 = vmatprep.mubr.msk.bf16.mxu1 %vm1171_vm0, %v1170_v0 }
 0x1b3   :  { %1055 = vmatpush3.bf16.msra.mxu0 %v1148_v50  ;;  %1082 = vmatprep.subr.bf16.mxu1 %v1170_v0 }
 0x1b4   :  { %1056 = vmatprep.subr.bf16.mxu0 %v1170_v0 }
 0x1b6   :  { %1083 = vmatpush3.bf16.msra.mxu1 %v1151_v51 }
 0x1b7   :  { %1057 = vmatpush3.bf16.msra.mxu0 %v1150_v52  ;;  %1084 = vmatprep.subr.bf16.mxu1 %v1170_v0 }
 0x1b8   :  { %1058 = vmatprep.subr.bf16.mxu0 %v1170_v0 }
 0x1ba   :  { %1085 = vmatpush3.bf16.msra.mxu1 %v1153_v53 }
 0x1bb   :  { %1059 = vmatpush3.bf16.msra.mxu0 %v1152_v54  ;;  %1086 = vmatprep.subr.bf16.mxu1 %v1170_v0 }
 0x1bc   :  { %1060 = vmatprep.subr.bf16.mxu0 %v1170_v0 }
 0x1be   :  { %1087 = vmatpush3.bf16.msra.mxu1 %v1155_v56 }
 0x1bf   :  { %1061 = vmatpush3.bf16.msra.mxu0 %v1154_v55  ;;  %1088 = vmatprep.subr.bf16.mxu1 %v1170_v0 }
 0x1c0   :  { %1062 = vmatprep.subr.bf16.mxu0 %v1170_v0 }
 0x1c2   :  { %1089 = vmatpush3.bf16.msra.mxu1 %v1157_v58 }
 0x1c3   :  { %1063 = vmatpush3.bf16.msra.mxu0 %v1156_v57  ;;  %1090 = vmatprep.subr.bf16.mxu1 %v1170_v0 }
 0x1c4   :  { %1100 = vmatprep.subr.bf16.mxu0 %v1170_v0 }
 0x1c6   :  { %1091 = vmatpush3.bf16.msra.mxu1 %v1158_v59 }
 0x1c7   :  { %1092 = vmatprep.subr.bf16.mxu1 %v1170_v0 }
 0x1ca   :  { %1093 = vmatpush3.bf16.msra.mxu1 %v1159_v60 }
 0x1cb   :  { %1094 = vmatprep.subr.bf16.mxu1 %v1170_v0 }
 0x1ce   :  { %1095 = vmatpush3.bf16.msra.mxu1 %v1160_v61 }
 0x265   :  { %v356_v63 = vpop.f32.mrf.mxu0 }
 0x266   :  { %v357_v1 = vadd.f32 %v356_v63, %v1362_v32  ;;  %v1163_v32 = vld [vmem:[%s1534_s9 + $0x30] sm:$0xff]   ;;  %s1175_s9 = smov 56  }
 0x267   :  { %v1046_v2 = vpop.f32.mrf.mxu0 }
 0x268   :  { %v368_v3 = vadd.f32 %v926_v62, %v357_v1  ;;  %v877_v62 = vpop.permute.xlu0 %876 }
 0x269   :  { %v359_v4 = vpop.f32.mrf.mxu0  ;;  %v528_v5 = vpop.f32.mrf.mxu1  ;;  %v895_v2 = vsel %vm101_vm2, %v1367_v38, %v877_v62 }
 0x26a   :  { %v369_v6 = vmax.f32 %v368_v3, 0.0 }
 0x26b   :  { %v1047_v7 = vpop.f32.mrf.mxu0  ;;  %v1072_v8 = vpop.f32.mrf.mxu1 }
 0x26c   :  { %v370_v9 = vpack.c.bf16 %v369_v6, %v369_v6 }
 0x26d   :  { %v531_v10 = vpop.f32.mrf.mxu1 }
 0x26e   :  { %1065 = vmatmul.mubr.bf16.vlgmr.msra.gmra.mxu0 %v370_v9 }
 0x26f   :  { %v1073_v11 = vpop.f32.mrf.mxu1  ;;  %1102 = vmatprep.mubr.msk.bf16.mxu0 %vm1171_vm0, %v1170_v0  ;;  %1101 = vmatpush3.bf16.msra.mxu0 %v1161_v21 }
 0x270   :  { %1106 = vmatprep.subr.bf16.mxu0 %v1170_v0 }
 0x271   :  { %v574_v13 = vpop.f32.mrf.mxu1 }
 0x272   :  { %v575_v14 = vadd.f32 %v574_v13, %v528_v5 }
 0x273   :  { %v1078_v15 = vpop.f32.mrf.mxu1 }
 0x274   :  { %v586_v16 = vadd.f32 %v940_v12, %v575_v14 }
 0x275   :  { %v577_v17 = vpop.f32.mrf.mxu1 }
 0x276   :  { %v587_v18 = vmax.f32 %v586_v16, 0.0 }
 0x277   :  { %v1079_v19 = vpop.f32.mrf.mxu1 }
 0x278   :  { %v588_v20 = vpack.c.bf16 %v587_v18, %v587_v18 }
 0x27a   :  { %1097 = vmatmul.mubr.bf16.vlgmr.msra.gmra.mxu1 %v588_v20 }
 0x32e   :  { %v475_v23 = vpop.f32.mrf.mxu0 }
 0x32f   :  { %v476_v24 = vadd.f32 %v927_v22, %v475_v23 }
 0x330   :  { %v1066_v25 = vpop.f32.mrf.mxu0 }
 0x331   :  { %v699_v26 = vpack.c.bf16 %v476_v24, %v476_v24  ;;  %880 = vrot.lane.b32.xlu0 %v476_v24, %s1173_s18 }
 0x332   :  { %v478_v27 = vpop.f32.mrf.mxu0 }
 0x333   :  { %v701_v28 = vrot.slane %v699_v26, 4 }
 0x334   :  { %v1067_v30 = vpop.f32.mrf.mxu0 }
 0x335   :  { %v703_v31 = vsel %vm83_vm1, %v1374_v41, %v701_v28 }
 0x336   :  { %1103 = vmatmul.mubr.msk.bf16.vlgmr.msra.gmra.mxu0 %vm101_vm2, %v703_v31 }
 0x337   :  { %1107 = vmatpush3.bf16.msra.mxu0 %v1162_v29  ;;  %1122 = vmatprep.mubr.msk.bf16.mxu0 %vm1171_vm0, %v1170_v0 }
 0x338   :  { %1108 = vmatprep.subr.bf16.mxu0 %v1170_v0 }
 0x33a   :  { %v693_v34 = vpop.f32.mrf.mxu1 }
 0x33b   :  { %v694_v35 = vadd.f32 %v941_v33, %v693_v34  ;;  %1109 = vmatpush3.bf16.msra.mxu0 %v1163_v32 }
 0x33c   :  { %v1098_v37 = vpop.f32.mrf.mxu1  ;;  %1110 = vmatprep.subr.bf16.mxu0 %v1170_v0 }
 0x33d   :  { %884 = vrot.lane.b32.xlu1 %v694_v35, %s1174_s0 }
 0x33e   :  { %v696_v39 = vpop.f32.mrf.mxu1 }
 0x33f   :  { %1111 = vmatpush3.bf16.msra.mxu0 %v1164_v36 }
 0x340   :  { %v1099_v41 = vpop.f32.mrf.mxu1  ;;  %1112 = vmatprep.subr.bf16.mxu0 %v1170_v0 }
 0x343   :  { %1113 = vmatpush3.bf16.msra.mxu0 %v1165_v40 }
 0x344   :  { %1114 = vmatprep.subr.bf16.mxu0 %v1170_v0 }
 0x347   :  { %1115 = vmatpush3.bf16.msra.mxu0 %v1166_v42 }
 0x348   :  { %1116 = vmatprep.subr.bf16.mxu0 %v1170_v0 }
 0x34b   :  { %1117 = vmatpush3.bf16.msra.mxu0 %v1167_v43 }
 0x34c   :  { %1118 = vmatprep.subr.bf16.mxu0 %v1170_v0 }
 0x34f   :  { %1119 = vmatpush3.bf16.msra.mxu0 %v1168_v44 }
 0x350   :  { %1120 = vmatprep.subr.bf16.mxu0 %v1170_v0  ;;  %v953_v0 = vld [vmem:[%s1537_s10] ss:$0 sm:$0xff] }
 0x353   :  { %1121 = vmatpush3.bf16.msra.mxu0 %v1169_v45 }
 0x3a3   :  { %v881_v1 = vpop.permute.xlu0 %880 }
 0x3a4   :  { %v897_v4 = vsel %vm896_vm4, %v895_v2, %v881_v1 }
 0x3af   :  { %v885_v63 = vpop.permute.xlu1 %884 }
 0x3b0   :  { %v899_v5 = vsel %vm898_vm5, %v897_v4, %v885_v63 }
 0x3f6   :  { %v754_v47 = vpop.f32.mrf.mxu0 }
 0x3f7   :  { %v755_v49 = vadd.f32 %v950_v46, %v754_v47 }
 0x3f8   :  { %v1104_v48 = vpop.f32.mrf.mxu0 }
 0x3f9   :  { %v761_v53 = vmax.f32 %v755_v49, 0.0 }
 0x3fa   :  { %v757_v50 = vpop.f32.mrf.mxu0 }
 0x3fb   :  { %v758_v51 = vadd.f32 %v950_v46, %v757_v50 }
 0x3fc   :  { %v1105_v52 = vpop.f32.mrf.mxu0 }
 0x3fd   :  { %v762_v54 = vmax.f32 %v758_v51, 0.0 }
 0x3ff   :  { %v763_v55 = vpack.c.bf16 %v762_v54, %v761_v53 }
 0x401   :  { %1123 = vmatmul.mubr.bf16.vlgmr.msra.gmra.mxu0 %v763_v55 }
 0x4c1   :  { %v868_v56 = vpop.f32.mrf.mxu0 }
 0x4c2   :  { %v869_v57 = vadd.f32 %v953_v0, %v868_v56 }
 0x4c3   :  { %v1124_v58 = vpop.f32.mrf.mxu0 }
 0x4c4   :  { %888 = vrot.lane.b32.xlu1 %v869_v57, %s1175_s9 }
 0x4c5   :  { %v871_v59 = vpop.f32.mrf.mxu0 }
 0x4c6   :  { %v872_v60 = vadd.f32 %v953_v0, %v871_v59 }
 0x4c7   :  { %v1125_v61 = vpop.f32.mrf.mxu0 }
 0x4c8   :  { %892 = vrot.lane.b32.xlu0 %v872_v60, %s1176_s8 }
 0x536   :  { %v889_v3 = vpop.permute.xlu1 %888 }
 0x537   :  { %v901_v6 = vsel %vm900_vm6, %v899_v5, %v889_v3 }
 0x53a   :  { %v893_v7 = vpop.permute.xlu0 %892 }
 0x53b   :  { %v903_v8 = vsel %vm902_vm7, %v901_v6, %v893_v7 }
 0x53c   :  { %v905_v9 = vsel %vm904_vm8, %v903_v8, 0.0 }
 0x53d   :  { %906 = vst [vmem:[%s1538_s21] sm:$0xff] %v905_v9 }

</bundles_post_ra>
